<compile_context>
chip_gen: v5e
topology: v5e:2x2
jax: 0.10.0
libtpu: 0.0.40
codegen_flags: <defaults>
</compile_context>

<pallas_src>
import functools

import jax
import jax.numpy as jnp
import numpy as np
from jax.experimental import pallas as pl
from jax.experimental.pallas import tpu as pltpu

SUBLANE = 8  # f32 sublane height (second-to-last dim granularity)


def _round_up(n, m):
    return ((n + m - 1) // m) * m


def _mlp_kernel(x_ref, w1_ref, w2_ref, w3_ref, b1_ref, b2_ref, b3_ref, o_ref):
    # x_ref: (TM, ob) f32   wN_ref: natural-shape bf16   bN_ref: (1, out) f32
    # Fused 3-layer MLP: bf16 matmuls on the MXU with f32 accumulation,
    # bias-add + ReLU on the VPU in f32.
    x = x_ref[...].astype(jnp.bfloat16)
    h = jnp.dot(x, w1_ref[...], preferred_element_type=jnp.float32) + b1_ref[...]
    h = jnp.maximum(h, 0.0)
    h = jnp.dot(h.astype(jnp.bfloat16), w2_ref[...],
                preferred_element_type=jnp.float32) + b2_ref[...]
    h = jnp.maximum(h, 0.0)
    out = jnp.dot(h.astype(jnp.bfloat16), w3_ref[...],
                  preferred_element_type=jnp.float32) + b3_ref[...]
    o_ref[...] = out.astype(o_ref.dtype)


def pack_params(params):
    """One-time (per PPO rollout) prep: cast weights to bf16, biases to f32.

    Hoisted out of the per-call forward path so the cast is not re-issued (and
    re-written to HBM) on every forward call.
    """
    return dict(
        w1=params["w1"].astype(jnp.bfloat16),
        w2=params["w2"].astype(jnp.bfloat16),
        w3=params["w3"].astype(jnp.bfloat16),
        b1=params["b1"].astype(jnp.float32),
        b2=params["b2"].astype(jnp.float32),
        b3=params["b3"].astype(jnp.float32),
    )


def gaussian_policy_forward(x, packed, block_m=4096):
    """x: (B, ob_size) f32.  packed: output of pack_params()."""
    batch, ob_size = x.shape
    hidden = packed["w1"].shape[1]
    act_size = packed["w3"].shape[1]

    # Batch tile: large by default to amortize per-step grid overhead; the
    # per-step tiles are tiny (ob_size f32 lanes in, act_size f32 lanes out),
    # so even TM=4096 double-buffered is ~1 MB of VMEM.
    tm = min(block_m, _round_up(batch, SUBLANE))
    # Prefer >= 2 grid steps when the batch allows it so the "parallel" batch
    # axis can shard across v7x's two TensorCores (no effect on v5e/v6e).
    if _round_up(batch, SUBLANE) >= 2 * SUBLANE:
        tm = min(tm, _round_up((batch + 1) // 2, SUBLANE))
    b_pad = _round_up(batch, tm)

    # Only batch-row padding (sublane granularity); no lane padding of x.
    x_p = x if b_pad == batch else jnp.pad(x, ((0, b_pad - batch), (0, 0)))

    grid = (b_pad // tm,)
    flops = 2 * b_pad * (ob_size * hidden + hidden * hidden + hidden * act_size)
    bytes_accessed = (
        x_p.size * x_p.dtype.itemsize
        + sum(int(packed[k].size) * packed[k].dtype.itemsize for k in packed)
        + b_pad * act_size * 4)

    out = pl.pallas_call(
        _mlp_kernel,
        out_shape=jax.ShapeDtypeStruct((b_pad, act_size), jnp.float32),
        grid=grid,
        in_specs=[
            pl.BlockSpec((tm, ob_size), lambda i: (i, 0)),      # x: tiled over batch
            pl.BlockSpec((ob_size, hidden), lambda i: (0, 0)),  # weights: VMEM-resident
            pl.BlockSpec((hidden, hidden), lambda i: (0, 0)),
            pl.BlockSpec((hidden, act_size), lambda i: (0, 0)),
            pl.BlockSpec((1, hidden), lambda i: (0, 0)),        # biases: VMEM-resident
            pl.BlockSpec((1, hidden), lambda i: (0, 0)),
            pl.BlockSpec((1, act_size), lambda i: (0, 0)),
        ],
        out_specs=pl.BlockSpec((tm, act_size), lambda i: (i, 0)),
        compiler_params=pltpu.CompilerParams(
            dimension_semantics=("parallel",),
            vmem_limit_bytes=32 * 1024 * 1024),
        cost_estimate=pl.CostEstimate(
            flops=flops, transcendentals=0, bytes_accessed=bytes_accessed),
    )(x_p, packed["w1"], packed["w2"], packed["w3"],
      packed["b1"], packed["b2"], packed["b3"])

    return out[:batch]


def init_params(key, ob_size, act_size, layer_size):
    """PyTorch-style init: U(-1/sqrt(fan_in), 1/sqrt(fan_in)); weights (in,out)."""
    ks = jax.random.split(key, 6)

    def lin(kw, kb, fan_in, fan_out):
        bound = 1.0 / np.sqrt(fan_in)
        w = jax.random.uniform(kw, (fan_in, fan_out), jnp.float32, -bound, bound)
        b = jax.random.uniform(kb, (1, fan_out), jnp.float32, -bound, bound)
        return w, b

    w1, b1 = lin(ks[0], ks[1], ob_size, layer_size)
    w2, b2 = lin(ks[2], ks[3], layer_size, layer_size)
    w3, b3 = lin(ks[4], ks[5], layer_size, act_size)
    return dict(w1=w1, b1=b1, w2=w2, b2=b2, w3=w3, b3=b3)


def _reference(x, p):
    h1 = jnp.maximum(x @ p["w1"] + p["b1"], 0.0)
    h2 = jnp.maximum(h1 @ p["w2"] + p["b2"], 0.0)
    return h2 @ p["w3"] + p["b3"]


if __name__ == "__main__":
    ob_size, act_size, layer_size = 16, 4, 32
    batch = 8

    key = jax.random.PRNGKey(0)
    kx, kp = jax.random.split(key)
    x = jax.random.normal(kx, (batch, ob_size), jnp.float32)
    params = init_params(kp, ob_size, act_size, layer_size)

    packed = jax.tree_util.tree_map(jax.block_until_ready, pack_params(params))

    fwd = jax.jit(functools.partial(gaussian_policy_forward, block_m=4096))
    mean = fwd(x, packed)
    mean = jax.block_until_ready(mean)

    # bf16 MXU inputs -> compare against the f32 reference with loosened tol.
    ref = _reference(x, params)
    np.testing.assert_allclose(np.asarray(mean), np.asarray(ref),
                               rtol=5e-2, atol=5e-2)

    print("KERNEL_OK")
</pallas_src>

<mosaic_0001>
module attributes {stable_mosaic.version = 11 : i64} {
  func.func @_mlp_kernel(%arg0: i32, %arg1: memref<8x16xf32, #tpu.memory_space<vmem>>, %arg2: memref<16x32xbf16, #tpu.memory_space<vmem>>, %arg3: memref<32x32xbf16, #tpu.memory_space<vmem>>, %arg4: memref<32x4xbf16, #tpu.memory_space<vmem>>, %arg5: memref<1x32xf32, #tpu.memory_space<vmem>>, %arg6: memref<1x32xf32, #tpu.memory_space<vmem>>, %arg7: memref<1x4xf32, #tpu.memory_space<vmem>>, %arg8: memref<8x4xf32, #tpu.memory_space<vmem>>) attributes {dimension_semantics = [#tpu.dimension_semantics<parallel>], iteration_bounds = array<i64: 1>, scalar_prefetch = 0 : i64, scratch_operands = 0 : i64, tpu.core_type = #tpu.core_type<tc>, window_params = [{transform_indices = @transform_0, window_bounds = array<i64: 8, 16>}, {pipeline_mode = #tpu.pipeline_mode<synchronous>, transform_indices = @transform_1, window_bounds = array<i64: 16, 32>}, {pipeline_mode = #tpu.pipeline_mode<synchronous>, transform_indices = @transform_2, window_bounds = array<i64: 32, 32>}, {pipeline_mode = #tpu.pipeline_mode<synchronous>, transform_indices = @transform_3, window_bounds = array<i64: 32, 4>}, {pipeline_mode = #tpu.pipeline_mode<synchronous>, transform_indices = @transform_4, window_bounds = array<i64: 1, 32>}, {pipeline_mode = #tpu.pipeline_mode<synchronous>, transform_indices = @transform_5, window_bounds = array<i64: 1, 32>}, {pipeline_mode = #tpu.pipeline_mode<synchronous>, transform_indices = @transform_6, window_bounds = array<i64: 1, 4>}, {transform_indices = @transform_7, window_bounds = array<i64: 8, 4>}]} {
    %c0 = arith.constant 0 : index
    %c0_0 = arith.constant 0 : index
    %0 = vector.load %arg1[%c0, %c0_0] : memref<8x16xf32, #tpu.memory_space<vmem>>, vector<8x16xf32>
    %1 = arith.truncf %0 : vector<8x16xf32> to vector<8x16xbf16>
    %c0_1 = arith.constant 0 : index
    %c0_2 = arith.constant 0 : index
    %2 = vector.load %arg2[%c0_1, %c0_2] : memref<16x32xbf16, #tpu.memory_space<vmem>>, vector<16x32xbf16>
    %cst = arith.constant dense<0.000000e+00> : vector<8x32xf32>
    %3 = tpu.matmul %1, %2, %cst {dimension_numbers = #tpu.dot_dimension_numbers<[1], [0], [0], [1], [0, 0, 1, 1], [], []>} : vector<8x16xbf16>, vector<16x32xbf16>, vector<8x32xf32> -> vector<8x32xf32>
    %c0_3 = arith.constant 0 : index
    %c0_4 = arith.constant 0 : index
    %4 = vector.load %arg5[%c0_3, %c0_4] : memref<1x32xf32, #tpu.memory_space<vmem>>, vector<1x32xf32>
    %5 = vector.broadcast %4 : vector<1x32xf32> to vector<8x32xf32>
    %6 = arith.addf %3, %5 : vector<8x32xf32>
    %cst_5 = arith.constant 0.000000e+00 : f32
    %7 = vector.broadcast %cst_5 : f32 to vector<8x32xf32>
    %8 = arith.maximumf %6, %7 : vector<8x32xf32>
    %9 = arith.truncf %8 : vector<8x32xf32> to vector<8x32xbf16>
    %c0_6 = arith.constant 0 : index
    %c0_7 = arith.constant 0 : index
    %10 = vector.load %arg3[%c0_6, %c0_7] : memref<32x32xbf16, #tpu.memory_space<vmem>>, vector<32x32xbf16>
    %cst_8 = arith.constant dense<0.000000e+00> : vector<8x32xf32>
    %11 = tpu.matmul %9, %10, %cst_8 {dimension_numbers = #tpu.dot_dimension_numbers<[1], [0], [0], [1], [0, 0, 1, 1], [], []>} : vector<8x32xbf16>, vector<32x32xbf16>, vector<8x32xf32> -> vector<8x32xf32>
    %c0_9 = arith.constant 0 : index
    %c0_10 = arith.constant 0 : index
    %12 = vector.load %arg6[%c0_9, %c0_10] : memref<1x32xf32, #tpu.memory_space<vmem>>, vector<1x32xf32>
    %13 = vector.broadcast %12 : vector<1x32xf32> to vector<8x32xf32>
    %14 = arith.addf %11, %13 : vector<8x32xf32>
    %cst_11 = arith.constant 0.000000e+00 : f32
    %15 = vector.broadcast %cst_11 : f32 to vector<8x32xf32>
    %16 = arith.maximumf %14, %15 : vector<8x32xf32>
    %17 = arith.truncf %16 : vector<8x32xf32> to vector<8x32xbf16>
    %c0_12 = arith.constant 0 : index
    %c0_13 = arith.constant 0 : index
    %18 = vector.load %arg4[%c0_12, %c0_13] : memref<32x4xbf16, #tpu.memory_space<vmem>>, vector<32x4xbf16>
    %cst_14 = arith.constant dense<0.000000e+00> : vector<8x4xf32>
    %19 = tpu.matmul %17, %18, %cst_14 {dimension_numbers = #tpu.dot_dimension_numbers<[1], [0], [0], [1], [0, 0, 1, 1], [], []>} : vector<8x32xbf16>, vector<32x4xbf16>, vector<8x4xf32> -> vector<8x4xf32>
    %c0_15 = arith.constant 0 : index
    %c0_16 = arith.constant 0 : index
    %20 = vector.load %arg7[%c0_15, %c0_16] : memref<1x4xf32, #tpu.memory_space<vmem>>, vector<1x4xf32>
    %21 = vector.broadcast %20 : vector<1x4xf32> to vector<8x4xf32>
    %22 = arith.addf %19, %21 : vector<8x4xf32>
    %c0_17 = arith.constant 0 : index
    %c0_18 = arith.constant 0 : index
    %23 = vector.load %arg8[%c0_17, %c0_18] : memref<8x4xf32, #tpu.memory_space<vmem>>, vector<8x4xf32>
    tpu.vector_store %arg8[%c0_17, %c0_18], %22 {strides = array<i32>} : memref<8x4xf32, #tpu.memory_space<vmem>>, vector<8x4xf32>,
    return
  }
  func.func @transform_0(%arg0: i32) -> (i32, i32) {
    %c0_i32 = arith.constant 0 : i32
    %c0_i32_0 = arith.constant 0 : i32
    return %arg0, %c0_i32 : i32, i32
  }
  func.func @transform_1(%arg0: i32) -> (i32, i32) {
    %c0_i32 = arith.constant 0 : i32
    %c0_i32_0 = arith.constant 0 : i32
    %c0_i32_1 = arith.constant 0 : i32
    return %c0_i32, %c0_i32_0 : i32, i32
  }
  func.func @transform_2(%arg0: i32) -> (i32, i32) {
    %c0_i32 = arith.constant 0 : i32
    %c0_i32_0 = arith.constant 0 : i32
    %c0_i32_1 = arith.constant 0 : i32
    return %c0_i32, %c0_i32_0 : i32, i32
  }
  func.func @transform_3(%arg0: i32) -> (i32, i32) {
    %c0_i32 = arith.constant 0 : i32
    %c0_i32_0 = arith.constant 0 : i32
    %c0_i32_1 = arith.constant 0 : i32
    return %c0_i32, %c0_i32_0 : i32, i32
  }
  func.func @transform_4(%arg0: i32) -> (i32, i32) {
    %c0_i32 = arith.constant 0 : i32
    %c0_i32_0 = arith.constant 0 : i32
    %c0_i32_1 = arith.constant 0 : i32
    return %c0_i32, %c0_i32_0 : i32, i32
  }
  func.func @transform_5(%arg0: i32) -> (i32, i32) {
    %c0_i32 = arith.constant 0 : i32
    %c0_i32_0 = arith.constant 0 : i32
    %c0_i32_1 = arith.constant 0 : i32
    return %c0_i32, %c0_i32_0 : i32, i32
  }
  func.func @transform_6(%arg0: i32) -> (i32, i32) {
    %c0_i32 = arith.constant 0 : i32
    %c0_i32_0 = arith.constant 0 : i32
    %c0_i32_1 = arith.constant 0 : i32
    return %c0_i32, %c0_i32_0 : i32, i32
  }
  func.func @transform_7(%arg0: i32) -> (i32, i32) {
    %c0_i32 = arith.constant 0 : i32
    %c0_i32_0 = arith.constant 0 : i32
    return %arg0, %c0_i32 : i32, i32
  }
}

</mosaic_0001>

<bundles_post_ra>
// kernel: gaussian_policy_forward.1
= control target key start
LH: loop header
LB: loop body
LE: loop exit
PB: predicated region body
PF: predicated region fallthrough
CT: control target
= control target key end

     0   :  { %12 = vsyncpa [#allocation3], 0  ;;  %s334_s0 = inlined_call_operand.hbm [shape: f32[8,16], index: 0, kind: input, shape index: {}]   ;;  %s335_s1 = inlined_call_operand.hbm [shape: bf16[16,32], index: 1, kind: input, shape index: {}]   ;;  %s336_s2 = inlined_call_operand.vmem [shape: bf16[32,32], index: 2, kind: input, shape index: {}]   ;;  %s337_s3 = inlined_call_operand.vmem [shape: bf16[32,4], index: 3, kind: input, shape index: {}]   ;;  %s338_s4 = inlined_call_operand.vmem [shape: f32[1,32], index: 4, kind: input, shape index: {}]   ;;  %s339_s5 = inlined_call_operand.vmem [shape: f32[1,32], index: 5, kind: input, shape index: {}]   ;;  %s340_s6 = inlined_call_operand.vmem [shape: f32[1,4], index: 6, kind: input, shape index: {}]   ;;  %s341_s7 = inlined_call_operand.vmem [shape: f32[8,4], index: 7, kind: output, shape index: {}]  }
   0x1   :  { %s19_s26 = sshll.u32 %s334_s0, 4  ;;  %s20_s26 = int_to_ptr.hbm [resolvable:$true] %s19_s26 }
   0x2   :  { %13 = vsyncpa [#allocation5], 0  ;;  %s260_s27 = smov [#allocation2]   ;;  %s29_s8 = sshll.u32 %s335_s1, 4  ;;  %s30_s8 = int_to_ptr.hbm [resolvable:$true] %s29_s8 }
   0x3   :  { %s21_s28 = sshll.u32 %s260_s27, 4  ;;  %s261_s9 = smov [#allocation4]   ;;  %s22_s28 = int_to_ptr.vmem [resolvable:$true] %s21_s28 }
   0x4   :  { %24 = dma.hbm_to_vmem [thread:$0]  %s20_s26, 128, %s22_s28, [#allocation3]  }
   0x5   :  { %s31_s10 = sshll.u32 %s261_s9, 4  ;;  %s262_s11 = smov 64   ;;  %s32_s10 = int_to_ptr.vmem [resolvable:$true] %s31_s10 }
   0x6   :  { %s263_s12 = smov 4  }
   0x7   :  { %37 = dma.hbm_to_vmem [thread:$0]  %s30_s8, 128, %s32_s10, [#allocation5], %s262_s11, %s262_s11, %s263_s12  }
   0x8   :  { %256 = dma.done.wait [#allocation3], 128  }
   0x9   :  { %257 = vsyncadd [#allocation3], 4294967168 }
   0xa   :  { %258 = dma.done.wait [#allocation5], 128  }
   0xb   :  { %259 = vsyncadd [#allocation5], 4294967168  ;;  %v196_v0 = vld [vmem:[#allocation4] sm:$0xff]  ;;  %v57_v1 = vld [vmem:[#allocation2] sm:$0xff]  ;;  %vm71_vm0 = vcmask 130048   ;;  %vm110_vm1 = vcmask 261120  }
   0xc   :  { %v58_v2 = vpack.c.bf16 %v57_v1, %v57_v1  ;;  %82 = vmatpush.bf16.msra.mxu0 %v196_v0  ;;  %v198_v3 = vld [vmem:[%s336_s2 + $0x8] sm:$0xff]  ;;  %v197_v4 = vld [vmem:[%s336_s2] sm:$0xff]  ;;  %vm165_vm2 = vcmask 31744  }
   0xd   :  { %120 = vmatpush.bf16.msra.mxu1 %v198_v3  ;;  %v205_v5 = vld [vmem:[%s338_s4] ss:$0 sm:$0xff]  ;;  %v200_v11 = vld [vmem:[%s337_s3 + $0x8] sm:$0xff] }
   0xe   :  { %158 = vmatpush.bf16.msra.mxu2 %v200_v11  ;;  %v199_v12 = vld [vmem:[%s337_s3] sm:$0xff] }
   0xf   :  { %177 = vmatmul.msk.bf16.vlgmr.msra.gmra.mxu0 %vm71_vm0, %v58_v2  ;;  %v206_v13 = vld [vmem:[%s339_s5] ss:$0 sm:$0xff] }
  0x10   :  { %v207_v19 = vld [vmem:[%s340_s6] ss:$0 sm:$0xff] }
  0x11   :  { %121 = vmatpush.bf16.msra.mxu1 %v197_v4 }
  0x12   :  { %159 = vmatpush.bf16.msra.mxu2 %v199_v12 }
  0x8c   :  { %v84_v6 = vpop.f32.mrf.mxu0 }
  0x8d   :  { %v85_v7 = vadd.f32 %v205_v5, %v84_v6 }
  0x8f   :  { %v88_v8 = vmax.f32 %v85_v7, 0.0 }
  0x91   :  { %v89_v9 = vpack.c.bf16 %v88_v8, %v88_v8 }
  0x93   :  { %186 = vmatmul.msk.bf16.vlgmr.msra.gmra.mxu1 %vm110_vm1, %v89_v9 }
  0x94   :  { %v86_v10 = vpop.f32.mrf.mxu0 }
 0x110   :  { %v123_v14 = vpop.f32.mrf.mxu1 }
 0x111   :  { %v124_v15 = vadd.f32 %v206_v13, %v123_v14 }
 0x113   :  { %v127_v16 = vmax.f32 %v124_v15, 0.0 }
 0x115   :  { %v128_v17 = vpack.c.bf16 %v127_v16, %v127_v16 }
 0x117   :  { %195 = vmatmul.msk.bf16.vlgmr.msra.gmra.mxu2 %vm110_vm1, %v128_v17 }
 0x118   :  { %v125_v18 = vpop.f32.mrf.mxu1 }
 0x19a   :  { %v161_v20 = vpop.f32.mrf.mxu2 }
 0x19b   :  { %v162_v21 = vadd.f32 %v207_v19, %v161_v20 }
 0x19d   :  { %166 = vst.msk [vmem:[%s341_s7] sm:$0xff] %vm165_vm2, %v162_v21 }
 0x1a2   :  { %v163_v22 = vpop.f32.mrf.mxu2 }
 0x1a3   :  { %171 = vsyncpa [#allocation3], 1 }
 0x1a4   :  { %172 = vsyncpa [#allocation5], 1 }

</bundles_post_ra>
